<compile_context>
chip_gen: v6e
topology: v6e:2x2x1
jax: 0.10.0
libtpu: 0.0.40
codegen_flags: <defaults>
</compile_context>

<pallas_src>
import functools

import jax
import jax.numpy as jnp
from jax.experimental import pallas as pl
from jax.experimental.pallas import tpu as pltpu

_SUB = 8              # sublanes per vreg
_LANE = 128           # lanes per vreg
_DEF_LANE_TILE = 512  # lanes per grid step (= 4096 batch elements per tile)


def _flow_kernel(sparams_ref, eps_ref, out_ref, *, n_flows, dim):
    """Planar-flow forward on one batch tile.

    sparams_ref: SMEM f32[(2*dim + n_flows*(2*dim+2),)]
                 [mu_0..mu_{D-1}, std_0..std_{D-1}] then per flow k:
                 [w_0..w_{D-1}, u_0..u_{D-1}, b_k, w_k.u_k]
    eps_ref:     VMEM f32[dim, 8, LT]        (batch packed dense on sublanes+lanes)
    out_ref:     VMEM f32[2*dim + 1, 8, LT]  rows 0:dim = z0, dim:2*dim = zk, last = ldj
    """
    # z0 rows: z0_d = eps_d * std_d + mu_d, stored directly (no concat/pack copy).
    z_rows = []
    for d in range(dim):
        mu_d = sparams_ref[d]
        std_d = sparams_ref[dim + d]
        z_d = eps_ref[d] * std_d + mu_d          # (8, LT) dense vreg block
        out_ref[d] = z_d
        z_rows.append(z_d)

    ldj = jnp.zeros_like(z_rows[0])              # running accumulator (no K live tiles)

    base0 = 2 * dim
    stride = 2 * dim + 2
    # TODO(synk): if n_flows/dim grow beyond toy sizes, switch these static unrolls to
    # lax.fori_loop(..., unroll=<small>) with dynamic SMEM indexing to bound live
    # ranges; at (dim=2, n_flows=10) full unroll is the right call.
    for k in range(n_flows):
        base = base0 + k * stride
        w = [sparams_ref[base + d] for d in range(dim)]
        u = [sparams_ref[base + dim + d] for d in range(dim)]
        b = sparams_ref[base + 2 * dim]
        wu = sparams_ref[base + 2 * dim + 1]     # precomputed w_k . u_k

        lin = z_rows[0] * w[0]                   # pure VPU mul/add, scalar coeffs
        for d in range(1, dim):
            lin = lin + z_rows[d] * w[d]
        lin = lin + b
        t = jnp.tanh(lin)                        # EUP

        # det = 1 + psi @ u^T == 1 + (1 - t^2) * (w . u); psi never formed.
        det_abs = jnp.abs(1.0 + (1.0 - t * t) * wu) + 1e-6
        ldj = ldj + jnp.log(det_abs)             # EUP log, off the z-carried chain

        z_rows = [z_rows[d] + u[d] * t for d in range(dim)]

    for d in range(dim):
        out_ref[dim + d] = z_rows[d]
    out_ref[2 * dim] = ldj


def _round_up(x, m):
    return ((x + m - 1) // m) * m


def packed_eps_shape(batch, dim):
    """Packed layout in which eps noise should be generated: (dim, 8, lanes)."""
    lanes = _round_up(max(pl.cdiv(batch, _SUB), 1), _LANE)
    return (dim, _SUB, lanes)


def _unpack_rows(rows, batch):
    """(d, 8, lanes) packed rows -> (batch, d). Flat batch index = sublane*lanes + lane."""
    d = rows.shape[0]
    return rows.reshape(d, -1).T[:batch]


def flow_forward(params, eps_packed, batch, *, lane_tile=_DEF_LANE_TILE):
    """Full Flow forward pass in one Pallas kernel.

    params:     dict with mu (D,), log_var (D,), u (K, D), w (K, D), b (K,)
    eps_packed: f32[D, 8, lanes] standard-normal noise in the packed batch layout
                (use packed_eps_shape(batch, dim); plays the role of torch.randn).
    batch:      number of valid batch elements (<= 8 * lanes)
    returns (z0, zk, ldj, mu, log_var) matching the PyTorch module.
    """
    mu, log_var = params["mu"], params["log_var"]
    u, w, b = params["u"], params["w"], params["b"]
    f32 = jnp.float32
    D = int(mu.shape[0])
    K = int(u.shape[0])
    Dp, sub, L = eps_packed.shape
    assert Dp == D and sub == _SUB and L % _LANE == 0 and D >= 1
    assert _SUB * L >= batch

    # Lane tile: multiple of 128 that divides L (lane-dense, unmasked stores).
    lt = min(lane_tile, L)
    while L % lt != 0:
        lt -= _LANE
    grid = (L // lt,)

    # Host-side scalar table (batch-independent, cheap):
    std = jnp.exp(0.5 * log_var.astype(f32))                        # (D,)
    wu = jnp.sum(w.astype(f32) * u.astype(f32), axis=1)             # (K,)
    flow_tab = jnp.concatenate(
        [w.astype(f32), u.astype(f32),
         b.reshape(K, 1).astype(f32), wu.reshape(K, 1)],
        axis=1,
    ).reshape(-1)                                                   # (K*(2D+2),)
    sparams = jnp.concatenate([mu.astype(f32), std, flow_tab])      # (2D + K*(2D+2),)

    kernel = functools.partial(_flow_kernel, n_flows=K, dim=D)

    # Double-buffered eps block + out block per grid step, with headroom.
    blk_bytes = 4 * _SUB * lt * (D + (2 * D + 1))
    vmem_limit = int(min(32 << 20, max(16 << 20, 8 * blk_bytes)))

    out = pl.pallas_call(
        kernel,
        out_shape=jax.ShapeDtypeStruct((2 * D + 1, _SUB, L), f32),
        grid=grid,
        in_specs=[
            pl.BlockSpec(memory_space=pltpu.MemorySpace.SMEM),       # scalar params
            pl.BlockSpec((D, _SUB, lt), lambda i: (0, 0, i)),        # eps batch tile
        ],
        out_specs=pl.BlockSpec((2 * D + 1, _SUB, lt), lambda i: (0, 0, i)),
        compiler_params=pltpu.CompilerParams(
            dimension_semantics=("parallel",),   # v7x: shard batch grid over both TCs
            vmem_limit_bytes=vmem_limit,
        ),
    )(sparams, eps_packed.astype(f32))

    # TODO(synk): consumers that can work in the packed (dim, 8, lanes) layout should
    # take `out` directly; this unpack costs one extra HBM pass (hurts most on v5e)
    # and exists only to match the PyTorch (batch, dim) return format.
    z0 = _unpack_rows(out[0:D], batch)
    zk = _unpack_rows(out[D:2 * D], batch)
    ldj = out[2 * D].reshape(-1)[:batch]
    return z0, zk, ldj, mu, log_var


def init_params(key, dim=2, n_flows=10):
    """Deterministic parameter init mirroring the module __init__ shapes."""
    k_mu, k_lv, k_u, k_w, k_b = jax.random.split(key, 5)
    return {
        "mu": 0.01 * jax.random.normal(k_mu, (dim,), jnp.float32),
        "log_var": 1.0 + 0.01 * jax.random.normal(k_lv, (dim,), jnp.float32),
        "u": 0.01 * jax.random.normal(k_u, (n_flows, dim), jnp.float32),
        "w": 0.01 * jax.random.normal(k_w, (n_flows, dim), jnp.float32),
        "b": 0.01 * jax.random.normal(k_b, (n_flows,), jnp.float32),
    }


def _reference(params, eps):
    """Pure-JAX reference for correctness check (eps in (batch, dim) layout)."""
    mu, log_var = params["mu"], params["log_var"]
    std = jnp.exp(0.5 * log_var)
    z0 = mu + eps * std
    z = z0
    ldj = jnp.zeros((eps.shape[0],), jnp.float32)
    for k in range(params["u"].shape[0]):
        u, w, b = params["u"][k], params["w"][k], params["b"][k]
        lin = z @ w + b
        t = jnp.tanh(lin)
        psi = (1.0 - t * t)[:, None] * w[None, :]
        det = 1.0 + psi @ u
        ldj = ldj + jnp.log(jnp.abs(det) + 1e-6)
        z = z + u[None, :] * t[:, None]
    return z0, z, ldj


if __name__ == "__main__":
    dim, n_flows, batch = 2, 10, 8
    key = jax.random.PRNGKey(0)
    k_params, k_eps = jax.random.split(key)

    params = init_params(k_params, dim=dim, n_flows=n_flows)
    # TODO(synk): torch.randn(shape) inside forward() is replaced by host-side noise
    # generated directly in the kernel's packed (dim, 8, lanes) layout, so no
    # transpose / extra HBM pass is needed before the kernel.
    eps_packed = jax.random.normal(k_eps, packed_eps_shape(batch, dim), jnp.float32)

    z0, zk, ldj, mu, log_var = flow_forward(params, eps_packed, batch)
    jax.block_until_ready((z0, zk, ldj, mu, log_var))

    # Correctness check against a pure-JAX reference (unpacked (batch, dim) view).
    eps_bd = _unpack_rows(eps_packed, batch)
    z0_ref, zk_ref, ldj_ref = _reference(params, eps_bd)
    assert jnp.allclose(z0, z0_ref, atol=1e-5), "z0 mismatch"
    assert jnp.allclose(zk, zk_ref, atol=1e-5), "zk mismatch"
    assert jnp.allclose(ldj, ldj_ref, atol=1e-5), "ldj mismatch"

    print("KERNEL_OK")
</pallas_src>

<mosaic_0001>
module attributes {stable_mosaic.version = 11 : i64} {
  func.func @_flow_kernel(%arg0: i32, %arg1: memref<64xf32, #tpu.memory_space<smem>>, %arg2: memref<2x8x128xf32, #tpu.memory_space<vmem>>, %arg3: memref<5x8x128xf32, #tpu.memory_space<vmem>>) attributes {dimension_semantics = [#tpu.dimension_semantics<parallel>], iteration_bounds = array<i64: 1>, scalar_prefetch = 0 : i64, scratch_operands = 0 : i64, tpu.core_type = #tpu.core_type<tc>, window_params = [{transform_indices = @transform_0, window_bounds = array<i64: 64>}, {transform_indices = @transform_1, window_bounds = array<i64: 2, 8, 128>}, {transform_indices = @transform_2, window_bounds = array<i64: 5, 8, 128>}]} {
    %c0 = arith.constant 0 : index
    %0 = memref.load %arg1[%c0] : memref<64xf32, #tpu.memory_space<smem>>
    %c2 = arith.constant 2 : index
    %1 = memref.load %arg1[%c2] : memref<64xf32, #tpu.memory_space<smem>>
    %c0_0 = arith.constant 0 : index
    %c0_1 = arith.constant 0 : index
    %c0_2 = arith.constant 0 : index
    %2 = vector.load %arg2[%c0_0, %c0_1, %c0_2] : memref<2x8x128xf32, #tpu.memory_space<vmem>>, vector<1x8x128xf32>
    %3 = vector.shape_cast %2 : vector<1x8x128xf32> to vector<8x128xf32>
    %4 = vector.broadcast %1 : f32 to vector<8x128xf32>
    %5 = arith.mulf %3, %4 : vector<8x128xf32>
    %6 = vector.broadcast %0 : f32 to vector<8x128xf32>
    %7 = arith.addf %5, %6 : vector<8x128xf32>
    %c0_3 = arith.constant 0 : index
    %c0_4 = arith.constant 0 : index
    %c0_5 = arith.constant 0 : index
    %8 = vector.load %arg3[%c0_3, %c0_4, %c0_5] : memref<5x8x128xf32, #tpu.memory_space<vmem>>, vector<1x8x128xf32>
    %9 = vector.shape_cast %8 : vector<1x8x128xf32> to vector<8x128xf32>
    %10 = vector.shape_cast %7 : vector<8x128xf32> to vector<1x8x128xf32>
    tpu.vector_store %arg3[%c0_3, %c0_4, %c0_5], %10 {strides = array<i32>} : memref<5x8x128xf32, #tpu.memory_space<vmem>>, vector<1x8x128xf32>,
    %c1 = arith.constant 1 : index
    %11 = memref.load %arg1[%c1] : memref<64xf32, #tpu.memory_space<smem>>
    %c3 = arith.constant 3 : index
    %12 = memref.load %arg1[%c3] : memref<64xf32, #tpu.memory_space<smem>>
    %c1_6 = arith.constant 1 : index
    %c0_7 = arith.constant 0 : index
    %c0_8 = arith.constant 0 : index
    %13 = vector.load %arg2[%c1_6, %c0_7, %c0_8] : memref<2x8x128xf32, #tpu.memory_space<vmem>>, vector<1x8x128xf32>
    %14 = vector.shape_cast %13 : vector<1x8x128xf32> to vector<8x128xf32>
    %15 = vector.broadcast %12 : f32 to vector<8x128xf32>
    %16 = arith.mulf %14, %15 : vector<8x128xf32>
    %17 = vector.broadcast %11 : f32 to vector<8x128xf32>
    %18 = arith.addf %16, %17 : vector<8x128xf32>
    %c1_9 = arith.constant 1 : index
    %c0_10 = arith.constant 0 : index
    %c0_11 = arith.constant 0 : index
    %19 = vector.load %arg3[%c1_9, %c0_10, %c0_11] : memref<5x8x128xf32, #tpu.memory_space<vmem>>, vector<1x8x128xf32>
    %20 = vector.shape_cast %19 : vector<1x8x128xf32> to vector<8x128xf32>
    %21 = vector.shape_cast %18 : vector<8x128xf32> to vector<1x8x128xf32>
    tpu.vector_store %arg3[%c1_9, %c0_10, %c0_11], %21 {strides = array<i32>} : memref<5x8x128xf32, #tpu.memory_space<vmem>>, vector<1x8x128xf32>,
    %cst = arith.constant 0.000000e+00 : f32
    %22 = vector.broadcast %cst : f32 to vector<8x128xf32>
    %c4 = arith.constant 4 : index
    %23 = memref.load %arg1[%c4] : memref<64xf32, #tpu.memory_space<smem>>
    %c5 = arith.constant 5 : index
    %24 = memref.load %arg1[%c5] : memref<64xf32, #tpu.memory_space<smem>>
    %c6 = arith.constant 6 : index
    %25 = memref.load %arg1[%c6] : memref<64xf32, #tpu.memory_space<smem>>
    %c7 = arith.constant 7 : index
    %26 = memref.load %arg1[%c7] : memref<64xf32, #tpu.memory_space<smem>>
    %c8 = arith.constant 8 : index
    %27 = memref.load %arg1[%c8] : memref<64xf32, #tpu.memory_space<smem>>
    %c9 = arith.constant 9 : index
    %28 = memref.load %arg1[%c9] : memref<64xf32, #tpu.memory_space<smem>>
    %29 = vector.broadcast %23 : f32 to vector<8x128xf32>
    %30 = arith.mulf %7, %29 : vector<8x128xf32>
    %31 = vector.broadcast %24 : f32 to vector<8x128xf32>
    %32 = arith.mulf %18, %31 : vector<8x128xf32>
    %33 = arith.addf %30, %32 : vector<8x128xf32>
    %34 = vector.broadcast %27 : f32 to vector<8x128xf32>
    %35 = arith.addf %33, %34 : vector<8x128xf32>
    %36 = math.tanh %35 : vector<8x128xf32>
    %37 = arith.mulf %36, %36 : vector<8x128xf32>
    %cst_12 = arith.constant 1.000000e+00 : f32
    %38 = vector.broadcast %cst_12 : f32 to vector<8x128xf32>
    %39 = arith.subf %38, %37 : vector<8x128xf32>
    %40 = vector.broadcast %28 : f32 to vector<8x128xf32>
    %41 = arith.mulf %39, %40 : vector<8x128xf32>
    %cst_13 = arith.constant 1.000000e+00 : f32
    %42 = vector.broadcast %cst_13 : f32 to vector<8x128xf32>
    %43 = arith.addf %42, %41 : vector<8x128xf32>
    %44 = math.absf %43 : vector<8x128xf32>
    %cst_14 = arith.constant 9.99999997E-7 : f32
    %45 = vector.broadcast %cst_14 : f32 to vector<8x128xf32>
    %46 = arith.addf %44, %45 : vector<8x128xf32>
    %47 = math.log %46 : vector<8x128xf32>
    %48 = arith.addf %22, %47 : vector<8x128xf32>
    %49 = vector.broadcast %25 : f32 to vector<8x128xf32>
    %50 = arith.mulf %49, %36 : vector<8x128xf32>
    %51 = arith.addf %7, %50 : vector<8x128xf32>
    %52 = vector.broadcast %26 : f32 to vector<8x128xf32>
    %53 = arith.mulf %52, %36 : vector<8x128xf32>
    %54 = arith.addf %18, %53 : vector<8x128xf32>
    %c10 = arith.constant 10 : index
    %55 = memref.load %arg1[%c10] : memref<64xf32, #tpu.memory_space<smem>>
    %c11 = arith.constant 11 : index
    %56 = memref.load %arg1[%c11] : memref<64xf32, #tpu.memory_space<smem>>
    %c12 = arith.constant 12 : index
    %57 = memref.load %arg1[%c12] : memref<64xf32, #tpu.memory_space<smem>>
    %c13 = arith.constant 13 : index
    %58 = memref.load %arg1[%c13] : memref<64xf32, #tpu.memory_space<smem>>
    %c14 = arith.constant 14 : index
    %59 = memref.load %arg1[%c14] : memref<64xf32, #tpu.memory_space<smem>>
    %c15 = arith.constant 15 : index
    %60 = memref.load %arg1[%c15] : memref<64xf32, #tpu.memory_space<smem>>
    %61 = vector.broadcast %55 : f32 to vector<8x128xf32>
    %62 = arith.mulf %51, %61 : vector<8x128xf32>
    %63 = vector.broadcast %56 : f32 to vector<8x128xf32>
    %64 = arith.mulf %54, %63 : vector<8x128xf32>
    %65 = arith.addf %62, %64 : vector<8x128xf32>
    %66 = vector.broadcast %59 : f32 to vector<8x128xf32>
    %67 = arith.addf %65, %66 : vector<8x128xf32>
    %68 = math.tanh %67 : vector<8x128xf32>
    %69 = arith.mulf %68, %68 : vector<8x128xf32>
    %cst_15 = arith.constant 1.000000e+00 : f32
    %70 = vector.broadcast %cst_15 : f32 to vector<8x128xf32>
    %71 = arith.subf %70, %69 : vector<8x128xf32>
    %72 = vector.broadcast %60 : f32 to vector<8x128xf32>
    %73 = arith.mulf %71, %72 : vector<8x128xf32>
    %cst_16 = arith.constant 1.000000e+00 : f32
    %74 = vector.broadcast %cst_16 : f32 to vector<8x128xf32>
    %75 = arith.addf %74, %73 : vector<8x128xf32>
    %76 = math.absf %75 : vector<8x128xf32>
    %cst_17 = arith.constant 9.99999997E-7 : f32
    %77 = vector.broadcast %cst_17 : f32 to vector<8x128xf32>
    %78 = arith.addf %76, %77 : vector<8x128xf32>
    %79 = math.log %78 : vector<8x128xf32>
    %80 = arith.addf %48, %79 : vector<8x128xf32>
    %81 = vector.broadcast %57 : f32 to vector<8x128xf32>
    %82 = arith.mulf %81, %68 : vector<8x128xf32>
    %83 = arith.addf %51, %82 : vector<8x128xf32>
    %84 = vector.broadcast %58 : f32 to vector<8x128xf32>
    %85 = arith.mulf %84, %68 : vector<8x128xf32>
    %86 = arith.addf %54, %85 : vector<8x128xf32>
    %c16 = arith.constant 16 : index
    %87 = memref.load %arg1[%c16] : memref<64xf32, #tpu.memory_space<smem>>
    %c17 = arith.constant 17 : index
    %88 = memref.load %arg1[%c17] : memref<64xf32, #tpu.memory_space<smem>>
    %c18 = arith.constant 18 : index
    %89 = memref.load %arg1[%c18] : memref<64xf32, #tpu.memory_space<smem>>
    %c19 = arith.constant 19 : index
    %90 = memref.load %arg1[%c19] : memref<64xf32, #tpu.memory_space<smem>>
    %c20 = arith.constant 20 : index
    %91 = memref.load %arg1[%c20] : memref<64xf32, #tpu.memory_space<smem>>
    %c21 = arith.constant 21 : index
    %92 = memref.load %arg1[%c21] : memref<64xf32, #tpu.memory_space<smem>>
    %93 = vector.broadcast %87 : f32 to vector<8x128xf32>
    %94 = arith.mulf %83, %93 : vector<8x128xf32>
    %95 = vector.broadcast %88 : f32 to vector<8x128xf32>
    %96 = arith.mulf %86, %95 : vector<8x128xf32>
    %97 = arith.addf %94, %96 : vector<8x128xf32>
    %98 = vector.broadcast %91 : f32 to vector<8x128xf32>
    %99 = arith.addf %97, %98 : vector<8x128xf32>
    %100 = math.tanh %99 : vector<8x128xf32>
    %101 = arith.mulf %100, %100 : vector<8x128xf32>
    %cst_18 = arith.constant 1.000000e+00 : f32
    %102 = vector.broadcast %cst_18 : f32 to vector<8x128xf32>
    %103 = arith.subf %102, %101 : vector<8x128xf32>
    %104 = vector.broadcast %92 : f32 to vector<8x128xf32>
    %105 = arith.mulf %103, %104 : vector<8x128xf32>
    %cst_19 = arith.constant 1.000000e+00 : f32
    %106 = vector.broadcast %cst_19 : f32 to vector<8x128xf32>
    %107 = arith.addf %106, %105 : vector<8x128xf32>
    %108 = math.absf %107 : vector<8x128xf32>
    %cst_20 = arith.constant 9.99999997E-7 : f32
    %109 = vector.broadcast %cst_20 : f32 to vector<8x128xf32>
    %110 = arith.addf %108, %109 : vector<8x128xf32>
    %111 = math.log %110 : vector<8x128xf32>
    %112 = arith.addf %80, %111 : vector<8x128xf32>
    %113 = vector.broadcast %89 : f32 to vector<8x128xf32>
    %114 = arith.mulf %113, %100 : vector<8x128xf32>
    %115 = arith.addf %83, %114 : vector<8x128xf32>
    %116 = vector.broadcast %90 : f32 to vector<8x128xf32>
    %117 = arith.mulf %116, %100 : vector<8x128xf32>
    %118 = arith.addf %86, %117 : vector<8x128xf32>
    %c22 = arith.constant 22 : index
    %119 = memref.load %arg1[%c22] : memref<64xf32, #tpu.memory_space<smem>>
    %c23 = arith.constant 23 : index
    %120 = memref.load %arg1[%c23] : memref<64xf32, #tpu.memory_space<smem>>
    %c24 = arith.constant 24 : index
    %121 = memref.load %arg1[%c24] : memref<64xf32, #tpu.memory_space<smem>>
    %c25 = arith.constant 25 : index
    %122 = memref.load %arg1[%c25] : memref<64xf32, #tpu.memory_space<smem>>
    %c26 = arith.constant 26 : index
    %123 = memref.load %arg1[%c26] : memref<64xf32, #tpu.memory_space<smem>>
    %c27 = arith.constant 27 : index
    %124 = memref.load %arg1[%c27] : memref<64xf32, #tpu.memory_space<smem>>
    %125 = vector.broadcast %119 : f32 to vector<8x128xf32>
    %126 = arith.mulf %115, %125 : vector<8x128xf32>
    %127 = vector.broadcast %120 : f32 to vector<8x128xf32>
    %128 = arith.mulf %118, %127 : vector<8x128xf32>
    %129 = arith.addf %126, %128 : vector<8x128xf32>
    %130 = vector.broadcast %123 : f32 to vector<8x128xf32>
    %131 = arith.addf %129, %130 : vector<8x128xf32>
    %132 = math.tanh %131 : vector<8x128xf32>
    %133 = arith.mulf %132, %132 : vector<8x128xf32>
    %cst_21 = arith.constant 1.000000e+00 : f32
    %134 = vector.broadcast %cst_21 : f32 to vector<8x128xf32>
    %135 = arith.subf %134, %133 : vector<8x128xf32>
    %136 = vector.broadcast %124 : f32 to vector<8x128xf32>
    %137 = arith.mulf %135, %136 : vector<8x128xf32>
    %cst_22 = arith.constant 1.000000e+00 : f32
    %138 = vector.broadcast %cst_22 : f32 to vector<8x128xf32>
    %139 = arith.addf %138, %137 : vector<8x128xf32>
    %140 = math.absf %139 : vector<8x128xf32>
    %cst_23 = arith.constant 9.99999997E-7 : f32
    %141 = vector.broadcast %cst_23 : f32 to vector<8x128xf32>
    %142 = arith.addf %140, %141 : vector<8x128xf32>
    %143 = math.log %142 : vector<8x128xf32>
    %144 = arith.addf %112, %143 : vector<8x128xf32>
    %145 = vector.broadcast %121 : f32 to vector<8x128xf32>
    %146 = arith.mulf %145, %132 : vector<8x128xf32>
    %147 = arith.addf %115, %146 : vector<8x128xf32>
    %148 = vector.broadcast %122 : f32 to vector<8x128xf32>
    %149 = arith.mulf %148, %132 : vector<8x128xf32>
    %150 = arith.addf %118, %149 : vector<8x128xf32>
    %c28 = arith.constant 28 : index
    %151 = memref.load %arg1[%c28] : memref<64xf32, #tpu.memory_space<smem>>
    %c29 = arith.constant 29 : index
    %152 = memref.load %arg1[%c29] : memref<64xf32, #tpu.memory_space<smem>>
    %c30 = arith.constant 30 : index
    %153 = memref.load %arg1[%c30] : memref<64xf32, #tpu.memory_space<smem>>
    %c31 = arith.constant 31 : index
    %154 = memref.load %arg1[%c31] : memref<64xf32, #tpu.memory_space<smem>>
    %c32 = arith.constant 32 : index
    %155 = memref.load %arg1[%c32] : memref<64xf32, #tpu.memory_space<smem>>
    %c33 = arith.constant 33 : index
    %156 = memref.load %arg1[%c33] : memref<64xf32, #tpu.memory_space<smem>>
    %157 = vector.broadcast %151 : f32 to vector<8x128xf32>
    %158 = arith.mulf %147, %157 : vector<8x128xf32>
    %159 = vector.broadcast %152 : f32 to vector<8x128xf32>
    %160 = arith.mulf %150, %159 : vector<8x128xf32>
    %161 = arith.addf %158, %160 : vector<8x128xf32>
    %162 = vector.broadcast %155 : f32 to vector<8x128xf32>
    %163 = arith.addf %161, %162 : vector<8x128xf32>
    %164 = math.tanh %163 : vector<8x128xf32>
    %165 = arith.mulf %164, %164 : vector<8x128xf32>
    %cst_24 = arith.constant 1.000000e+00 : f32
    %166 = vector.broadcast %cst_24 : f32 to vector<8x128xf32>
    %167 = arith.subf %166, %165 : vector<8x128xf32>
    %168 = vector.broadcast %156 : f32 to vector<8x128xf32>
    %169 = arith.mulf %167, %168 : vector<8x128xf32>
    %cst_25 = arith.constant 1.000000e+00 : f32
    %170 = vector.broadcast %cst_25 : f32 to vector<8x128xf32>
    %171 = arith.addf %170, %169 : vector<8x128xf32>
    %172 = math.absf %171 : vector<8x128xf32>
    %cst_26 = arith.constant 9.99999997E-7 : f32
    %173 = vector.broadcast %cst_26 : f32 to vector<8x128xf32>
    %174 = arith.addf %172, %173 : vector<8x128xf32>
    %175 = math.log %174 : vector<8x128xf32>
    %176 = arith.addf %144, %175 : vector<8x128xf32>
    %177 = vector.broadcast %153 : f32 to vector<8x128xf32>
    %178 = arith.mulf %177, %164 : vector<8x128xf32>
    %179 = arith.addf %147, %178 : vector<8x128xf32>
    %180 = vector.broadcast %154 : f32 to vector<8x128xf32>
    %181 = arith.mulf %180, %164 : vector<8x128xf32>
    %182 = arith.addf %150, %181 : vector<8x128xf32>
    %c34 = arith.constant 34 : index
    %183 = memref.load %arg1[%c34] : memref<64xf32, #tpu.memory_space<smem>>
    %c35 = arith.constant 35 : index
    %184 = memref.load %arg1[%c35] : memref<64xf32, #tpu.memory_space<smem>>
    %c36 = arith.constant 36 : index
    %185 = memref.load %arg1[%c36] : memref<64xf32, #tpu.memory_space<smem>>
    %c37 = arith.constant 37 : index
    %186 = memref.load %arg1[%c37] : memref<64xf32, #tpu.memory_space<smem>>
    %c38 = arith.constant 38 : index
    %187 = memref.load %arg1[%c38] : memref<64xf32, #tpu.memory_space<smem>>
    %c39 = arith.constant 39 : index
    %188 = memref.load %arg1[%c39] : memref<64xf32, #tpu.memory_space<smem>>
    %189 = vector.broadcast %183 : f32 to vector<8x128xf32>
    %190 = arith.mulf %179, %189 : vector<8x128xf32>
    %191 = vector.broadcast %184 : f32 to vector<8x128xf32>
    %192 = arith.mulf %182, %191 : vector<8x128xf32>
    %193 = arith.addf %190, %192 : vector<8x128xf32>
    %194 = vector.broadcast %187 : f32 to vector<8x128xf32>
    %195 = arith.addf %193, %194 : vector<8x128xf32>
    %196 = math.tanh %195 : vector<8x128xf32>
    %197 = arith.mulf %196, %196 : vector<8x128xf32>
    %cst_27 = arith.constant 1.000000e+00 : f32
    %198 = vector.broadcast %cst_27 : f32 to vector<8x128xf32>
    %199 = arith.subf %198, %197 : vector<8x128xf32>
    %200 = vector.broadcast %188 : f32 to vector<8x128xf32>
    %201 = arith.mulf %199, %200 : vector<8x128xf32>
    %cst_28 = arith.constant 1.000000e+00 : f32
    %202 = vector.broadcast %cst_28 : f32 to vector<8x128xf32>
    %203 = arith.addf %202, %201 : vector<8x128xf32>
    %204 = math.absf %203 : vector<8x128xf32>
    %cst_29 = arith.constant 9.99999997E-7 : f32
    %205 = vector.broadcast %cst_29 : f32 to vector<8x128xf32>
    %206 = arith.addf %204, %205 : vector<8x128xf32>
    %207 = math.log %206 : vector<8x128xf32>
    %208 = arith.addf %176, %207 : vector<8x128xf32>
    %209 = vector.broadcast %185 : f32 to vector<8x128xf32>
    %210 = arith.mulf %209, %196 : vector<8x128xf32>
    %211 = arith.addf %179, %210 : vector<8x128xf32>
    %212 = vector.broadcast %186 : f32 to vector<8x128xf32>
    %213 = arith.mulf %212, %196 : vector<8x128xf32>
    %214 = arith.addf %182, %213 : vector<8x128xf32>
    %c40 = arith.constant 40 : index
    %215 = memref.load %arg1[%c40] : memref<64xf32, #tpu.memory_space<smem>>
    %c41 = arith.constant 41 : index
    %216 = memref.load %arg1[%c41] : memref<64xf32, #tpu.memory_space<smem>>
    %c42 = arith.constant 42 : index
    %217 = memref.load %arg1[%c42] : memref<64xf32, #tpu.memory_space<smem>>
    %c43 = arith.constant 43 : index
    %218 = memref.load %arg1[%c43] : memref<64xf32, #tpu.memory_space<smem>>
    %c44 = arith.constant 44 : index
    %219 = memref.load %arg1[%c44] : memref<64xf32, #tpu.memory_space<smem>>
    %c45 = arith.constant 45 : index
    %220 = memref.load %arg1[%c45] : memref<64xf32, #tpu.memory_space<smem>>
    %221 = vector.broadcast %215 : f32 to vector<8x128xf32>
    %222 = arith.mulf %211, %221 : vector<8x128xf32>
    %223 = vector.broadcast %216 : f32 to vector<8x128xf32>
    %224 = arith.mulf %214, %223 : vector<8x128xf32>
    %225 = arith.addf %222, %224 : vector<8x128xf32>
    %226 = vector.broadcast %219 : f32 to vector<8x128xf32>
    %227 = arith.addf %225, %226 : vector<8x128xf32>
    %228 = math.tanh %227 : vector<8x128xf32>
    %229 = arith.mulf %228, %228 : vector<8x128xf32>
    %cst_30 = arith.constant 1.000000e+00 : f32
    %230 = vector.broadcast %cst_30 : f32 to vector<8x128xf32>
    %231 = arith.subf %230, %229 : vector<8x128xf32>
    %232 = vector.broadcast %220 : f32 to vector<8x128xf32>
    %233 = arith.mulf %231, %232 : vector<8x128xf32>
    %cst_31 = arith.constant 1.000000e+00 : f32
    %234 = vector.broadcast %cst_31 : f32 to vector<8x128xf32>
    %235 = arith.addf %234, %233 : vector<8x128xf32>
    %236 = math.absf %235 : vector<8x128xf32>
    %cst_32 = arith.constant 9.99999997E-7 : f32
    %237 = vector.broadcast %cst_32 : f32 to vector<8x128xf32>
    %238 = arith.addf %236, %237 : vector<8x128xf32>
    %239 = math.log %238 : vector<8x128xf32>
    %240 = arith.addf %208, %239 : vector<8x128xf32>
    %241 = vector.broadcast %217 : f32 to vector<8x128xf32>
    %242 = arith.mulf %241, %228 : vector<8x128xf32>
    %243 = arith.addf %211, %242 : vector<8x128xf32>
    %244 = vector.broadcast %218 : f32 to vector<8x128xf32>
    %245 = arith.mulf %244, %228 : vector<8x128xf32>
    %246 = arith.addf %214, %245 : vector<8x128xf32>
    %c46 = arith.constant 46 : index
    %247 = memref.load %arg1[%c46] : memref<64xf32, #tpu.memory_space<smem>>
    %c47 = arith.constant 47 : index
    %248 = memref.load %arg1[%c47] : memref<64xf32, #tpu.memory_space<smem>>
    %c48 = arith.constant 48 : index
    %249 = memref.load %arg1[%c48] : memref<64xf32, #tpu.memory_space<smem>>
    %c49 = arith.constant 49 : index
    %250 = memref.load %arg1[%c49] : memref<64xf32, #tpu.memory_space<smem>>
    %c50 = arith.constant 50 : index
    %251 = memref.load %arg1[%c50] : memref<64xf32, #tpu.memory_space<smem>>
    %c51 = arith.constant 51 : index
    %252 = memref.load %arg1[%c51] : memref<64xf32, #tpu.memory_space<smem>>
    %253 = vector.broadcast %247 : f32 to vector<8x128xf32>
    %254 = arith.mulf %243, %253 : vector<8x128xf32>
    %255 = vector.broadcast %248 : f32 to vector<8x128xf32>
    %256 = arith.mulf %246, %255 : vector<8x128xf32>
    %257 = arith.addf %254, %256 : vector<8x128xf32>
    %258 = vector.broadcast %251 : f32 to vector<8x128xf32>
    %259 = arith.addf %257, %258 : vector<8x128xf32>
    %260 = math.tanh %259 : vector<8x128xf32>
    %261 = arith.mulf %260, %260 : vector<8x128xf32>
    %cst_33 = arith.constant 1.000000e+00 : f32
    %262 = vector.broadcast %cst_33 : f32 to vector<8x128xf32>
    %263 = arith.subf %262, %261 : vector<8x128xf32>
    %264 = vector.broadcast %252 : f32 to vector<8x128xf32>
    %265 = arith.mulf %263, %264 : vector<8x128xf32>
    %cst_34 = arith.constant 1.000000e+00 : f32
    %266 = vector.broadcast %cst_34 : f32 to vector<8x128xf32>
    %267 = arith.addf %266, %265 : vector<8x128xf32>
    %268 = math.absf %267 : vector<8x128xf32>
    %cst_35 = arith.constant 9.99999997E-7 : f32
    %269 = vector.broadcast %cst_35 : f32 to vector<8x128xf32>
    %270 = arith.addf %268, %269 : vector<8x128xf32>
    %271 = math.log %270 : vector<8x128xf32>
    %272 = arith.addf %240, %271 : vector<8x128xf32>
    %273 = vector.broadcast %249 : f32 to vector<8x128xf32>
    %274 = arith.mulf %273, %260 : vector<8x128xf32>
    %275 = arith.addf %243, %274 : vector<8x128xf32>
    %276 = vector.broadcast %250 : f32 to vector<8x128xf32>
    %277 = arith.mulf %276, %260 : vector<8x128xf32>
    %278 = arith.addf %246, %277 : vector<8x128xf32>
    %c52 = arith.constant 52 : index
    %279 = memref.load %arg1[%c52] : memref<64xf32, #tpu.memory_space<smem>>
    %c53 = arith.constant 53 : index
    %280 = memref.load %arg1[%c53] : memref<64xf32, #tpu.memory_space<smem>>
    %c54 = arith.constant 54 : index
    %281 = memref.load %arg1[%c54] : memref<64xf32, #tpu.memory_space<smem>>
    %c55 = arith.constant 55 : index
    %282 = memref.load %arg1[%c55] : memref<64xf32, #tpu.memory_space<smem>>
    %c56 = arith.constant 56 : index
    %283 = memref.load %arg1[%c56] : memref<64xf32, #tpu.memory_space<smem>>
    %c57 = arith.constant 57 : index
    %284 = memref.load %arg1[%c57] : memref<64xf32, #tpu.memory_space<smem>>
    %285 = vector.broadcast %279 : f32 to vector<8x128xf32>
    %286 = arith.mulf %275, %285 : vector<8x128xf32>
    %287 = vector.broadcast %280 : f32 to vector<8x128xf32>
    %288 = arith.mulf %278, %287 : vector<8x128xf32>
    %289 = arith.addf %286, %288 : vector<8x128xf32>
    %290 = vector.broadcast %283 : f32 to vector<8x128xf32>
    %291 = arith.addf %289, %290 : vector<8x128xf32>
    %292 = math.tanh %291 : vector<8x128xf32>
    %293 = arith.mulf %292, %292 : vector<8x128xf32>
    %cst_36 = arith.constant 1.000000e+00 : f32
    %294 = vector.broadcast %cst_36 : f32 to vector<8x128xf32>
    %295 = arith.subf %294, %293 : vector<8x128xf32>
    %296 = vector.broadcast %284 : f32 to vector<8x128xf32>
    %297 = arith.mulf %295, %296 : vector<8x128xf32>
    %cst_37 = arith.constant 1.000000e+00 : f32
    %298 = vector.broadcast %cst_37 : f32 to vector<8x128xf32>
    %299 = arith.addf %298, %297 : vector<8x128xf32>
    %300 = math.absf %299 : vector<8x128xf32>
    %cst_38 = arith.constant 9.99999997E-7 : f32
    %301 = vector.broadcast %cst_38 : f32 to vector<8x128xf32>
    %302 = arith.addf %300, %301 : vector<8x128xf32>
    %303 = math.log %302 : vector<8x128xf32>
    %304 = arith.addf %272, %303 : vector<8x128xf32>
    %305 = vector.broadcast %281 : f32 to vector<8x128xf32>
    %306 = arith.mulf %305, %292 : vector<8x128xf32>
    %307 = arith.addf %275, %306 : vector<8x128xf32>
    %308 = vector.broadcast %282 : f32 to vector<8x128xf32>
    %309 = arith.mulf %308, %292 : vector<8x128xf32>
    %310 = arith.addf %278, %309 : vector<8x128xf32>
    %c58 = arith.constant 58 : index
    %311 = memref.load %arg1[%c58] : memref<64xf32, #tpu.memory_space<smem>>
    %c59 = arith.constant 59 : index
    %312 = memref.load %arg1[%c59] : memref<64xf32, #tpu.memory_space<smem>>
    %c60 = arith.constant 60 : index
    %313 = memref.load %arg1[%c60] : memref<64xf32, #tpu.memory_space<smem>>
    %c61 = arith.constant 61 : index
    %314 = memref.load %arg1[%c61] : memref<64xf32, #tpu.memory_space<smem>>
    %c62 = arith.constant 62 : index
    %315 = memref.load %arg1[%c62] : memref<64xf32, #tpu.memory_space<smem>>
    %c63 = arith.constant 63 : index
    %316 = memref.load %arg1[%c63] : memref<64xf32, #tpu.memory_space<smem>>
    %317 = vector.broadcast %311 : f32 to vector<8x128xf32>
    %318 = arith.mulf %307, %317 : vector<8x128xf32>
    %319 = vector.broadcast %312 : f32 to vector<8x128xf32>
    %320 = arith.mulf %310, %319 : vector<8x128xf32>
    %321 = arith.addf %318, %320 : vector<8x128xf32>
    %322 = vector.broadcast %315 : f32 to vector<8x128xf32>
    %323 = arith.addf %321, %322 : vector<8x128xf32>
    %324 = math.tanh %323 : vector<8x128xf32>
    %325 = arith.mulf %324, %324 : vector<8x128xf32>
    %cst_39 = arith.constant 1.000000e+00 : f32
    %326 = vector.broadcast %cst_39 : f32 to vector<8x128xf32>
    %327 = arith.subf %326, %325 : vector<8x128xf32>
    %328 = vector.broadcast %316 : f32 to vector<8x128xf32>
    %329 = arith.mulf %327, %328 : vector<8x128xf32>
    %cst_40 = arith.constant 1.000000e+00 : f32
    %330 = vector.broadcast %cst_40 : f32 to vector<8x128xf32>
    %331 = arith.addf %330, %329 : vector<8x128xf32>
    %332 = math.absf %331 : vector<8x128xf32>
    %cst_41 = arith.constant 9.99999997E-7 : f32
    %333 = vector.broadcast %cst_41 : f32 to vector<8x128xf32>
    %334 = arith.addf %332, %333 : vector<8x128xf32>
    %335 = math.log %334 : vector<8x128xf32>
    %336 = arith.addf %304, %335 : vector<8x128xf32>
    %337 = vector.broadcast %313 : f32 to vector<8x128xf32>
    %338 = arith.mulf %337, %324 : vector<8x128xf32>
    %339 = arith.addf %307, %338 : vector<8x128xf32>
    %340 = vector.broadcast %314 : f32 to vector<8x128xf32>
    %341 = arith.mulf %340, %324 : vector<8x128xf32>
    %342 = arith.addf %310, %341 : vector<8x128xf32>
    %c2_42 = arith.constant 2 : index
    %c0_43 = arith.constant 0 : index
    %c0_44 = arith.constant 0 : index
    %343 = vector.load %arg3[%c2_42, %c0_43, %c0_44] : memref<5x8x128xf32, #tpu.memory_space<vmem>>, vector<1x8x128xf32>
    %344 = vector.shape_cast %343 : vector<1x8x128xf32> to vector<8x128xf32>
    %345 = vector.shape_cast %339 : vector<8x128xf32> to vector<1x8x128xf32>
    tpu.vector_store %arg3[%c2_42, %c0_43, %c0_44], %345 {strides = array<i32>} : memref<5x8x128xf32, #tpu.memory_space<vmem>>, vector<1x8x128xf32>,
    %c3_45 = arith.constant 3 : index
    %c0_46 = arith.constant 0 : index
    %c0_47 = arith.constant 0 : index
    %346 = vector.load %arg3[%c3_45, %c0_46, %c0_47] : memref<5x8x128xf32, #tpu.memory_space<vmem>>, vector<1x8x128xf32>
    %347 = vector.shape_cast %346 : vector<1x8x128xf32> to vector<8x128xf32>
    %348 = vector.shape_cast %342 : vector<8x128xf32> to vector<1x8x128xf32>
    tpu.vector_store %arg3[%c3_45, %c0_46, %c0_47], %348 {strides = array<i32>} : memref<5x8x128xf32, #tpu.memory_space<vmem>>, vector<1x8x128xf32>,
    %c4_48 = arith.constant 4 : index
    %c0_49 = arith.constant 0 : index
    %c0_50 = arith.constant 0 : index
    %349 = vector.load %arg3[%c4_48, %c0_49, %c0_50] : memref<5x8x128xf32, #tpu.memory_space<vmem>>, vector<1x8x128xf32>
    %350 = vector.shape_cast %349 : vector<1x8x128xf32> to vector<8x128xf32>
    %351 = vector.shape_cast %336 : vector<8x128xf32> to vector<1x8x128xf32>
    tpu.vector_store %arg3[%c4_48, %c0_49, %c0_50], %351 {strides = array<i32>} : memref<5x8x128xf32, #tpu.memory_space<vmem>>, vector<1x8x128xf32>,
    return
  }
  func.func @transform_0(%arg0: i32) -> i32 {
    %c0_i32 = arith.constant 0 : i32
    %c0_i32_0 = arith.constant 0 : i32
    return %c0_i32 : i32
  }
  func.func @transform_1(%arg0: i32) -> (i32, i32, i32) {
    %c0_i32 = arith.constant 0 : i32
    %c0_i32_0 = arith.constant 0 : i32
    %c0_i32_1 = arith.constant 0 : i32
    return %c0_i32, %c0_i32_0, %arg0 : i32, i32, i32
  }
  func.func @transform_2(%arg0: i32) -> (i32, i32, i32) {
    %c0_i32 = arith.constant 0 : i32
    %c0_i32_0 = arith.constant 0 : i32
    %c0_i32_1 = arith.constant 0 : i32
    return %c0_i32, %c0_i32_0, %arg0 : i32, i32, i32
  }
}

</mosaic_0001>

<bundles_post_ra>
// kernel: tpu_custom_call.1
= control target key start
LH: loop header
LB: loop body
LE: loop exit
PB: predicated region body
PF: predicated region fallthrough
CT: control target
= control target key end

     0   :  { %7 = vsyncpa [#allocation5], 0  ;;  %s588_s0 = inlined_call_operand.hbm [shape: f32[64], index: 0, kind: input, shape index: {}]   ;;  %s589_s1 = inlined_call_operand.hbm [shape: f32[2,8,128], index: 1, kind: input, shape index: {}]   ;;  %s590_s2 = inlined_call_operand.hbm [shape: f32[5,8,128], index: 2, kind: output, shape index: {}]  }
   0x1   :  { %8 = vsyncpa [#allocation3], 0 }
   0x2   :  { %9 = vsyncpa [#allocation4], 0  ;;  %s541_s9 = smov [#allocation2]   ;;  %s542_s12 = smov [#allocation6]  }
   0x3   :  { %17 = dma.hbm_to_smem %s588_s0, 16, %s541_s9, [#allocation5]  }
   0x4   :  { %s23_s13 = sshll.u32 %s542_s12, 4  ;;  %s24_s13 = int_to_ptr.vmem [resolvable:$true] %s23_s13 }
   0x5   :  { %s503_s14 = scalar_lea.vmem %s24_s13, 256  ;;  %p508_p1 = scmp.lt.s32.totalorder %s24_s13, %s24_s13 }
   0x6   :  { %p504_p0 = scmp.ne.s32.totalorder %s24_s13, %s503_s14  ;;  %p509_p2 = scmp.lt.s32.totalorder %s503_s14, %s503_s14 }
   0x8   :  { %p510_p3 = por %p509_p2, %p508_p1 }
   0xa   :  { %p511_p4 = pnand %p510_p3, %p504_p0 }
   0xc   :  { %514 = shalt.err (!%p511_p4)
}
   0xd   :  { %s543_s15 = smov 128   ;;  %s544_s16 = smov 8  }
   0xe   :  { %29 = dma.hbm_to_vmem [thread:$0]  %s589_s1, 256, %s24_s13, [#allocation3], %s543_s15, %s543_s15, %s544_s16  }
   0xf   :  { %535 = dma.done.wait [#allocation5], 16  }
  0x10   :  { %536 = vsyncadd [#allocation5], 4294967280 }
  0x11   :  { %537 = dma.done.wait [#allocation3], 256  }
  0x12   :  { %538 = vsyncadd [#allocation3], 4294967040 }
  0x13   :  { %36 = sfence }
  0x14   :  { %s37_s0 = sld [smem:[#allocation2]]  ;;  %v39_v0 = vld [vmem:[#allocation6] sm:$0xff]  ;;  %v48_v4 = vld [vmem:[#allocation6 + $0x8] sm:$0xff] }
  0x15   :  { %s379_s19 = sld [smem:[#allocation2 + $0x2]] }
  0x16   :  { %s382_s20 = sld [smem:[#allocation2 + $0x4]] }
  0x17   :  { %s380_s21 = sld [smem:[#allocation2 + $0x1]] }
  0x18   :  { %s381_s22 = sld [smem:[#allocation2 + $0x3]] }
  0x19   :  { %s383_s23 = sld [smem:[#allocation2 + $0x5]] }
  0x1a   :  { %v42_v2 = vstv %s37_s0  ;;  %s386_s24 = sld [smem:[#allocation2 + $0x8]] }
  0x1b   :  { %v40_v1 = vstv %s379_s19  ;;  %s384_s1 = sld [smem:[#allocation2 + $0x6]] }
  0x1c   :  { %v41_v3 = vmul.f32 %v40_v1, %v39_v0  ;;  %v61_v6 = vstv %s382_s20  ;;  %s385_s25 = sld [smem:[#allocation2 + $0x7]] }
  0x1d   :  { %v51_v8 = vstv %s380_s21  ;;  %s388_s26 = sld [smem:[#allocation2 + $0xa]] }
  0x1e   :  { %v43_v5 = vadd.f32 %v42_v2, %v41_v3  ;;  %v49_v7 = vstv %s381_s22  ;;  %s389_s27 = sld [smem:[#allocation2 + $0xb]] }
  0x1f   :  { %v50_v9 = vmul.f32 %v49_v7, %v48_v4  ;;  %v63_v10 = vstv %s383_s23  ;;  %s392_s28 = sld [smem:[#allocation2 + $0xe]] }
  0x20   :  { %44 = vst [vmem:[#allocation7] sm:$0xff] %v43_v5  ;;  %v62_v11 = vmul.f32 %v61_v6, %v43_v5  ;;  %v66_v14 = vstv %s386_s24  ;;  %s390_s29 = sld [smem:[#allocation2 + $0xc]] }
  0x21   :  { %v52_v12 = vadd.f32 %v51_v8, %v50_v9  ;;  %v79_v17 = vstv %s384_s1  ;;  %s391_s30 = sld [smem:[#allocation2 + $0xd]] }
  0x22   :  { %v82_v18 = vstv %s385_s25  ;;  %s394_s3 = sld [smem:[#allocation2 + $0x10]] }
  0x23   :  { %54 = vst [vmem:[#allocation7 + $0x8] sm:$0xff] %v52_v12  ;;  %v64_v13 = vmul.f32 %v63_v10, %v52_v12  ;;  %v91_v22 = vstv %s388_s26  ;;  %s395_s4 = sld [smem:[#allocation2 + $0x11]] }
  0x24   :  { %v93_v23 = vstv %s389_s27  ;;  %s398_s5 = sld [smem:[#allocation2 + $0x14]] }
  0x25   :  { %v65_v15 = vadd.f32 %v64_v13, %v62_v11  ;;  %v96_v28 = vstv %s392_s28  ;;  %s397_s6 = sld [smem:[#allocation2 + $0x13]] }
  0x26   :  { %v109_v31 = vstv %s390_s29  ;;  %s396_s7 = sld [smem:[#allocation2 + $0x12]] }
  0x27   :  { %v67_v16 = vadd.f32 %v66_v14, %v65_v15  ;;  %v112_v32 = vstv %s391_s30  ;;  %s401_s8 = sld [smem:[#allocation2 + $0x17]] }
  0x28   :  { %v121_v36 = vstv %s394_s3  ;;  %s400_s9 = sld [smem:[#allocation2 + $0x16]] }
  0x29   :  { %447 = vtanh.f32 %v67_v16  ;;  %v123_v37 = vstv %s395_s4  ;;  %s404_s10 = sld [smem:[#allocation2 + $0x1a]] }
  0x2a   :  { %v126_v42 = vstv %s398_s5  ;;  %s402_s11 = sld [smem:[#allocation2 + $0x18]] }
  0x2b   :  { %v142_v45 = vstv %s397_s6  ;;  %s403_s12 = sld [smem:[#allocation2 + $0x19]] }
  0x2c   :  { %v139_v46 = vstv %s396_s7  ;;  %s406_s13 = sld [smem:[#allocation2 + $0x1c]] }
  0x2d   :  { %v153_v50 = vstv %s401_s8  ;;  %s407_s14 = sld [smem:[#allocation2 + $0x1d]] }
  0x2e   :  { %v151_v51 = vstv %s400_s9  ;;  %s574_s17 = sld [smem:[#allocation2 + $0x20]] }
  0x2f   :  { %v156_v56 = vstv %s404_s10  ;;  %s387_s18 = sld [smem:[#allocation2 + $0x9]] }
  0x30   :  { %v169_v59 = vstv %s402_s11  ;;  %s393_s0 = sld [smem:[#allocation2 + $0xf]] }
  0x31   :  { %v172_v60 = vstv %s403_s12  ;;  %s399_s19 = sld [smem:[#allocation2 + $0x15]] }
  0x32   :  { %v181_v2 = vstv %s406_s13  ;;  %s405_s20 = sld [smem:[#allocation2 + $0x1b]] }
  0x33   :  { %v183_v3 = vstv %s407_s14  ;;  %s408_s21 = sld [smem:[#allocation2 + $0x1e]] }
  0x34   :  { %v186_v7 = vstv %s574_s17  ;;  %s409_s22 = sld [smem:[#allocation2 + $0x1f]] }
  0x35   :  { %v71_v8 = vstv %s387_s18  ;;  %s412_s23 = sld [smem:[#allocation2 + $0x22]] }
  0x36   :  { %v570_v19 = vpop.eup %447  ;;  %v101_v14 = vstv %s393_s0  ;;  %s413_s24 = sld [smem:[#allocation2 + $0x23]] }
  0x37   :  { %v80_v20 = vmul.f32 %v570_v19, %v79_v17  ;;  %v83_v21 = vmul.f32 %v570_v19, %v82_v18  ;;  %v69_v0 = vmul.f32 %v570_v19, %v570_v19  ;;  %v131_v17 = vstv %s399_s19  ;;  %s411_s1 = sld [smem:[#allocation2 + $0x21]] }
  0x38   :  { %s416_s25 = sld [smem:[#allocation2 + $0x26]] }
  0x39   :  { %v81_v24 = vadd.f32 %v80_v20, %v43_v5  ;;  %v84_v25 = vadd.f32 %v83_v21, %v52_v12  ;;  %v70_v6 = vsub.f32 1.0, %v69_v0  ;;  %s414_s26 = sld [smem:[#allocation2 + $0x24]] }
  0x3a   :  { %s415_s27 = sld [smem:[#allocation2 + $0x25]] }
  0x3b   :  { %v92_v26 = vmul.f32 %v91_v22, %v81_v24  ;;  %v94_v27 = vmul.f32 %v93_v23, %v84_v25  ;;  %v72_v13 = vmul.f32 %v71_v8, %v70_v6  ;;  %s418_s28 = sld [smem:[#allocation2 + $0x28]] }
  0x3c   :  { %s419_s29 = sld [smem:[#allocation2 + $0x29]] }
  0x3d   :  { %v95_v29 = vadd.f32 %v94_v27, %v92_v26  ;;  %v73_v20 = vadd.f32 1.0, %v72_v13  ;;  %s417_s30 = sld [smem:[#allocation2 + $0x27]] }
  0x3e   :  { %s422_s3 = sld [smem:[#allocation2 + $0x2c]] }
  0x3f   :  { %v97_v30 = vadd.f32 %v96_v28, %v95_v29  ;;  %v74_v26 = vand.u32 2147483647, %v73_v20  ;;  %s420_s4 = sld [smem:[#allocation2 + $0x2a]] }
  0x40   :  { %v232_v6 = vstv %s415_s27  ;;  %s421_s5 = sld [smem:[#allocation2 + $0x2b]] }
  0x41   :  { %449 = vtanh.f32 %v97_v30  ;;  %v75_v30 = vadd.f32 1e-06, %v74_v26  ;;  %s424_s6 = sld [smem:[#allocation2 + $0x2e]] }
  0x42   :  { %s425_s7 = sld [smem:[#allocation2 + $0x2f]] }
  0x43   :  { %v221_v13 = vstv %s417_s30  ;;  %s423_s8 = sld [smem:[#allocation2 + $0x2d]] }
  0x44   :  { %s428_s9 = sld [smem:[#allocation2 + $0x32]] }
  0x45   :  { %s426_s10 = sld [smem:[#allocation2 + $0x30]] }
  0x46   :  { %s427_s11 = sld [smem:[#allocation2 + $0x31]] }
  0x47   :  { %s430_s12 = sld [smem:[#allocation2 + $0x34]] }
  0x48   :  { %s431_s13 = sld [smem:[#allocation2 + $0x35]] }
  0x49   :  { %s434_s14 = sld [smem:[#allocation2 + $0x38]] }
  0x4a   :  { %s432_s17 = sld [smem:[#allocation2 + $0x36]] }
  0x4b   :  { %s433_s18 = sld [smem:[#allocation2 + $0x37]] }
  0x4c   :  { %s436_s0 = sld [smem:[#allocation2 + $0x3a]] }
  0x4d   :  { %s437_s19 = sld [smem:[#allocation2 + $0x3b]] }
  0x4e   :  { %v450_v33 = vpop.eup %449 }
  0x4f   :  { %v110_v34 = vmul.f32 %v450_v33, %v109_v31  ;;  %v113_v35 = vmul.f32 %v450_v33, %v112_v32  ;;  %v99_v1 = vmul.f32 %v450_v33, %v450_v33 }
  0x51   :  { %v111_v38 = vadd.f32 %v110_v34, %v81_v24  ;;  %v114_v39 = vadd.f32 %v113_v35, %v84_v25  ;;  %v100_v9 = vsub.f32 1.0, %v99_v1  ;;  %v161_v24 = vstv %s405_s20  ;;  %s429_s20 = sld [smem:[#allocation2 + $0x33]] }
  0x53   :  { %v122_v40 = vmul.f32 %v121_v36, %v111_v38  ;;  %v124_v41 = vmul.f32 %v123_v37, %v114_v39  ;;  %v102_v15 = vmul.f32 %v101_v14, %v100_v9  ;;  %v199_v37 = vstv %s408_s21  ;;  %s440_s21 = sld [smem:[#allocation2 + $0x3e]] }
  0x55   :  { %v125_v43 = vadd.f32 %v124_v41, %v122_v40  ;;  %v103_v21 = vadd.f32 1.0, %v102_v15 }
  0x57   :  { %v127_v44 = vadd.f32 %v126_v42, %v125_v43  ;;  %v104_v27 = vand.u32 2147483647, %v103_v21 }
  0x59   :  { %451 = vtanh.f32 %v127_v44  ;;  %v105_v31 = vadd.f32 1e-06, %v104_v27  ;;  %v211_v44 = vstv %s412_s23  ;;  %s438_s23 = sld [smem:[#allocation2 + $0x3c]] }
  0x66   :  { %v452_v47 = vpop.eup %451 }
  0x67   :  { %v143_v48 = vmul.f32 %v452_v47, %v142_v45  ;;  %v140_v49 = vmul.f32 %v452_v47, %v139_v46  ;;  %v129_v10 = vmul.f32 %v452_v47, %v452_v47  ;;  %v213_v45 = vstv %s413_s24  ;;  %s439_s24 = sld [smem:[#allocation2 + $0x3d]] }
  0x69   :  { %v144_v52 = vadd.f32 %v143_v48, %v114_v39  ;;  %v141_v53 = vadd.f32 %v140_v49, %v111_v38  ;;  %v130_v16 = vsub.f32 1.0, %v129_v10  ;;  %v202_v38 = vstv %s409_s22  ;;  %s435_s22 = sld [smem:[#allocation2 + $0x39]] }
  0x6b   :  { %v154_v54 = vmul.f32 %v153_v50, %v144_v52  ;;  %v152_v55 = vmul.f32 %v151_v51, %v141_v53  ;;  %v132_v22 = vmul.f32 %v131_v17, %v130_v16  ;;  %v191_v50 = vstv %s411_s1  ;;  %s441_s1 = sld [smem:[#allocation2 + $0x3f]] }
  0x6d   :  { %v155_v57 = vadd.f32 %v154_v54, %v152_v55  ;;  %v133_v28 = vadd.f32 1.0, %v132_v22  ;;  %v246_v22 = vstv %s422_s3 }
  0x6f   :  { %v157_v58 = vadd.f32 %v156_v56, %v155_v57  ;;  %v134_v32 = vand.u32 2147483647, %v133_v28  ;;  %v216_v56 = vstv %s416_s25  ;;  %s545_s25 = smov [#allocation7]  }
  0x71   :  { %453 = vtanh.f32 %v157_v58  ;;  %v135_v34 = vadd.f32 1e-06, %v134_v32 }
  0x7e   :  { %v454_v61 = vpop.eup %453 }
  0x7f   :  { %v170_v62 = vmul.f32 %v454_v61, %v169_v59  ;;  %v173_v63 = vmul.f32 %v454_v61, %v172_v60  ;;  %v159_v18 = vmul.f32 %v454_v61, %v454_v61 }
  0x81   :  { %v171_v4 = vadd.f32 %v170_v62, %v141_v53  ;;  %v174_v5 = vadd.f32 %v173_v63, %v144_v52  ;;  %v160_v23 = vsub.f32 1.0, %v159_v18 }
  0x83   :  { %v182_v11 = vmul.f32 %v181_v2, %v171_v4  ;;  %v184_v12 = vmul.f32 %v183_v3, %v174_v5  ;;  %v162_v29 = vmul.f32 %v161_v24, %v160_v23 }
  0x85   :  { %v185_v19 = vadd.f32 %v184_v12, %v182_v11  ;;  %v163_v33 = vadd.f32 1.0, %v162_v29  ;;  %v241_v11 = vstv %s418_s28  ;;  %v243_v12 = vstv %s419_s29 }
  0x86   :  { %v259_v29 = vstv %s420_s4 }
  0x87   :  { %v187_v25 = vadd.f32 %v186_v7, %v185_v19  ;;  %v164_v35 = vand.u32 2147483647, %v163_v33 }
  0x89   :  { %455 = vtanh.f32 %v187_v25  ;;  %v165_v36 = vadd.f32 1e-06, %v164_v35 }
  0x8a   :  { %457 = vlog2.f32 %v75_v30  ;;  %v262_v30 = vstv %s421_s5 }
  0x8b   :  { %459 = vlog2.f32 %v105_v31 }
  0x8c   :  { %461 = vlog2.f32 %v135_v34 }
  0x8d   :  { %463 = vlog2.f32 %v165_v36  ;;  %v271_v36 = vstv %s424_s6 }
  0x96   :  { %v456_v39 = vpop.eup %455 }
  0x97   :  { %v200_v40 = vmul.f32 %v456_v39, %v199_v37  ;;  %v203_v41 = vmul.f32 %v456_v39, %v202_v38  ;;  %v189_v42 = vmul.f32 %v456_v39, %v456_v39  ;;  %v458_v43 = vpop.eup %457  ;;  %v273_v37 = vstv %s425_s7 }
  0x98   :  { %v460_v46 = vpop.eup %459  ;;  %v77_v49 = vmul.f32 0.6931472, %v458_v43  ;;  %v251_v38 = vstv %s423_s8 }
  0x99   :  { %v201_v47 = vadd.f32 %v200_v40, %v171_v4  ;;  %v204_v48 = vadd.f32 %v203_v41, %v174_v5  ;;  %v107_v51 = vmul.f32 0.6931472, %v460_v46  ;;  %v190_v52 = vsub.f32 1.0, %v189_v42  ;;  %v462_v53 = vpop.eup %461 }
  0x9a   :  { %v137_v58 = vmul.f32 0.6931472, %v462_v53  ;;  %v464_v60 = vpop.eup %463  ;;  %v229_v5 = vstv %s414_s26  ;;  %v289_v53 = vstv %s426_s10  ;;  %s366_s26 = sshll.u32 %s545_s25, 4  ;;  %s367_s26 = int_to_ptr.vmem [resolvable:$true] %s366_s26 }
  0x9b   :  { %v212_v54 = vmul.f32 %v211_v44, %v201_v47  ;;  %v214_v55 = vmul.f32 %v213_v45, %v204_v48  ;;  %v108_v57 = vadd.f32 %v107_v51, %v77_v49  ;;  %v192_v59 = vmul.f32 %v191_v50, %v190_v52  ;;  %s515_s27 = scalar_lea.vmem %s367_s26, 640  ;;  %p520_p6 = scmp.lt.s32.totalorder %s367_s26, %s367_s26 }
  0x9c   :  { %v167_v63 = vmul.f32 0.6931472, %v464_v60  ;;  %v303_v60 = vstv %s431_s13  ;;  %p516_p5 = scmp.ne.s32.totalorder %s367_s26, %s515_s27  ;;  %p521_p7 = scmp.lt.s32.totalorder %s515_s27, %s515_s27 }
  0x9d   :  { %v215_v61 = vadd.f32 %v214_v55, %v212_v54  ;;  %v138_v62 = vadd.f32 %v137_v58, %v108_v57  ;;  %v193_v0 = vadd.f32 1.0, %v192_v59  ;;  %v292_v54 = vstv %s427_s11 }
  0x9e   :  { %v301_v59 = vstv %s430_s12  ;;  %p522_p8 = por %p521_p7, %p520_p6 }
  0x9f   :  { %v217_v1 = vadd.f32 %v216_v56, %v215_v61  ;;  %v168_v2 = vadd.f32 %v167_v63, %v138_v62  ;;  %v194_v3 = vand.u32 2147483647, %v193_v0 }
  0xa0   :  { %p523_p9 = pnand %p522_p8, %p516_p5 }
  0xa1   :  { %465 = vtanh.f32 %v217_v1  ;;  %v195_v4 = vadd.f32 1e-06, %v194_v3  ;;  %v306_v3 = vstv %s434_s14 }
  0xa3   :  { %467 = vlog2.f32 %v195_v4 }
  0xae   :  { %v466_v7 = vpop.eup %465 }
  0xaf   :  { %v230_v8 = vmul.f32 %v466_v7, %v229_v5  ;;  %v233_v9 = vmul.f32 %v466_v7, %v232_v6  ;;  %v219_v10 = vmul.f32 %v466_v7, %v466_v7  ;;  %v319_v6 = vstv %s432_s17 }
  0xb0   :  { %v468_v14 = vpop.eup %467  ;;  %v322_v7 = vstv %s433_s18 }
  0xb1   :  { %v231_v15 = vadd.f32 %v230_v8, %v201_v47  ;;  %v234_v16 = vadd.f32 %v233_v9, %v204_v48  ;;  %v220_v17 = vsub.f32 1.0, %v219_v10  ;;  %v197_v18 = vmul.f32 0.6931472, %v468_v14 }
  0xb2   :  { %v276_v47 = vstv %s428_s9 }
  0xb3   :  { %v242_v19 = vmul.f32 %v241_v11, %v231_v15  ;;  %v244_v20 = vmul.f32 %v243_v12, %v234_v16  ;;  %v222_v21 = vmul.f32 %v221_v13, %v220_v17  ;;  %v198_v23 = vadd.f32 %v197_v18, %v168_v2 }
  0xb4   :  { %v331_v12 = vstv %s436_s0  ;;  %v333_v13 = vstv %s437_s19 }
  0xb5   :  { %v245_v24 = vadd.f32 %v244_v20, %v242_v19  ;;  %v223_v25 = vadd.f32 1.0, %v222_v21  ;;  %v281_v19 = vstv %s429_s20  ;;  %v336_v21 = vstv %s440_s21 }
  0xb7   :  { %v247_v26 = vadd.f32 %v246_v22, %v245_v24  ;;  %v224_v27 = vand.u32 2147483647, %v223_v25 }
  0xb9   :  { %469 = vtanh.f32 %v247_v26  ;;  %v225_v28 = vadd.f32 1e-06, %v224_v27  ;;  %v311_v26 = vstv %s435_s22 }
  0xbb   :  { %471 = vlog2.f32 %v225_v28 }
  0xc6   :  { %v470_v31 = vpop.eup %469 }
  0xc7   :  { %v260_v32 = vmul.f32 %v470_v31, %v259_v29  ;;  %v263_v33 = vmul.f32 %v470_v31, %v262_v30  ;;  %v249_v34 = vmul.f32 %v470_v31, %v470_v31 }
  0xc8   :  { %v472_v35 = vpop.eup %471 }
  0xc9   :  { %v261_v39 = vadd.f32 %v260_v32, %v231_v15  ;;  %v264_v40 = vadd.f32 %v263_v33, %v234_v16  ;;  %v227_v41 = vmul.f32 0.6931472, %v472_v35  ;;  %v250_v42 = vsub.f32 1.0, %v249_v34 }
  0xca   :  { %v349_v33 = vstv %s438_s23  ;;  %v352_v34 = vstv %s439_s24 }
  0xcb   :  { %v272_v43 = vmul.f32 %v271_v36, %v261_v39  ;;  %v274_v44 = vmul.f32 %v273_v37, %v264_v40  ;;  %v228_v45 = vadd.f32 %v227_v41, %v198_v23  ;;  %v252_v46 = vmul.f32 %v251_v38, %v250_v42 }
  0xcd   :  { %v275_v48 = vadd.f32 %v274_v44, %v272_v43  ;;  %v253_v49 = vadd.f32 1.0, %v252_v46 }
  0xcf   :  { %v277_v50 = vadd.f32 %v276_v47, %v275_v48  ;;  %v254_v51 = vand.u32 2147483647, %v253_v49 }
  0xd1   :  { %473 = vtanh.f32 %v277_v50  ;;  %v255_v52 = vadd.f32 1e-06, %v254_v51 }
  0xd3   :  { %475 = vlog2.f32 %v255_v52 }
  0xde   :  { %v474_v55 = vpop.eup %473 }
  0xdf   :  { %v290_v56 = vmul.f32 %v474_v55, %v289_v53  ;;  %v293_v57 = vmul.f32 %v474_v55, %v292_v54  ;;  %v279_v9 = vmul.f32 %v474_v55, %v474_v55 }
  0xe0   :  { %v476_v58 = vpop.eup %475 }
  0xe1   :  { %v291_v61 = vadd.f32 %v290_v56, %v261_v39  ;;  %v294_v62 = vadd.f32 %v293_v57, %v264_v40  ;;  %v257_v63 = vmul.f32 0.6931472, %v476_v58  ;;  %v280_v16 = vsub.f32 1.0, %v279_v9 }
  0xe2   :  { %v341_v40 = vstv %s441_s1 }
  0xe3   :  { %v302_v0 = vmul.f32 %v301_v59, %v291_v61  ;;  %v304_v1 = vmul.f32 %v303_v60, %v294_v62  ;;  %v579_v2 = vadd.f32 %v257_v63, %v228_v45  ;;  %v282_v23 = vmul.f32 %v281_v19, %v280_v16 }
  0xe5   :  { %v305_v4 = vadd.f32 %v304_v1, %v302_v0  ;;  %v283_v27 = vadd.f32 1.0, %v282_v23 }
  0xe7   :  { %v307_v5 = vadd.f32 %v306_v3, %v305_v4  ;;  %v284_v29 = vand.u32 2147483647, %v283_v27 }
  0xe9   :  { %477 = vtanh.f32 %v307_v5  ;;  %v285_v31 = vadd.f32 1e-06, %v284_v29 }
  0xf6   :  { %v478_v8 = vpop.eup %477 }
  0xf7   :  { %v320_v10 = vmul.f32 %v478_v8, %v319_v6  ;;  %v323_v11 = vmul.f32 %v478_v8, %v322_v7  ;;  %v309_v20 = vmul.f32 %v478_v8, %v478_v8 }
  0xf9   :  { %v321_v14 = vadd.f32 %v320_v10, %v291_v61  ;;  %v324_v15 = vadd.f32 %v323_v11, %v294_v62  ;;  %v310_v25 = vsub.f32 1.0, %v309_v20 }
  0xfb   :  { %v332_v17 = vmul.f32 %v331_v12, %v321_v14  ;;  %v334_v18 = vmul.f32 %v333_v13, %v324_v15  ;;  %v312_v28 = vmul.f32 %v311_v26, %v310_v25 }
  0xfd   :  { %v335_v22 = vadd.f32 %v334_v18, %v332_v17  ;;  %v313_v30 = vadd.f32 1.0, %v312_v28 }
  0xff   :  { %v337_v24 = vadd.f32 %v336_v21, %v335_v22  ;;  %v314_v32 = vand.u32 2147483647, %v313_v30 }
 0x101   :  { %479 = vtanh.f32 %v337_v24  ;;  %v315_v38 = vadd.f32 1e-06, %v314_v32 }
 0x102   :  { %481 = vlog2.f32 %v285_v31 }
 0x103   :  { %483 = vlog2.f32 %v315_v38 }
 0x10e   :  { %v480_v35 = vpop.eup %479 }
 0x10f   :  { %v350_v36 = vmul.f32 %v480_v35, %v349_v33  ;;  %v353_v37 = vmul.f32 %v480_v35, %v352_v34  ;;  %v339_v39 = vmul.f32 %v480_v35, %v480_v35  ;;  %v482_v48 = vpop.eup %481 }
 0x110   :  { %v287_v49 = vmul.f32 0.6931472, %v482_v48  ;;  %v484_v50 = vpop.eup %483 }
 0x111   :  { %v351_v41 = vadd.f32 %v350_v36, %v321_v14  ;;  %v354_v42 = vadd.f32 %v353_v37, %v324_v15  ;;  %v340_v43 = vsub.f32 1.0, %v339_v39  ;;  %v317_v52 = vmul.f32 0.6931472, %v484_v50 }
 0x112   :  { %v288_v51 = vadd.f32 %v287_v49, %v579_v2 }
 0x113   :  { %356 = vst [vmem:[#allocation7 + $0x10] sm:$0xff] %v351_v41  ;;  %358 = vst [vmem:[#allocation7 + $0x18] sm:$0xff] %v354_v42  ;;  %v342_v44 = vmul.f32 %v341_v40, %v340_v43 }
 0x114   :  { %v318_v53 = vadd.f32 %v317_v52, %v288_v51 }
 0x115   :  { %v343_v45 = vadd.f32 1.0, %v342_v44 }
 0x117   :  { %v344_v46 = vand.u32 2147483647, %v343_v45 }
 0x119   :  { %v345_v47 = vadd.f32 1e-06, %v344_v46 }
 0x11b   :  { %485 = vlog2.f32 %v345_v47 }
 0x128   :  { %v486_v54 = vpop.eup %485 }
 0x129   :  { %v347_v55 = vmul.f32 0.6931472, %v486_v54 }
 0x12b   :  { %v348_v56 = vadd.f32 %v347_v55, %v318_v53 }
 0x12d   :  { %360 = vst [vmem:[#allocation7 + $0x20] sm:$0xff] %v348_v56 }
 0x12e   :  { %526 = shalt.err (!%p523_p9)
}
 0x12f   :  { %372 = dma.vmem_to_hbm [thread:$0]  %s367_s26, 640, %s590_s2, [#allocation4], %s543_s15, %s543_s15, %s544_s16  }
 0x130   :  { %539 = dma.done.wait [#allocation4], 640  }
 0x131   :  { %540 = vsyncadd [#allocation4], 4294966656 }
 0x132   :  { %376 = vsyncpa [#allocation3], 1 }
 0x133   :  { %377 = vsyncpa [#allocation4], 1 }
 0x134   :  { %378 = vsyncpa [#allocation5], 1 }

</bundles_post_ra>
